<compile_context>
chip_gen: v7x
topology: tpu7x:2x2x1
jax: 0.10.0
libtpu: 0.0.40
codegen_flags: <defaults>
</compile_context>

<pallas_src>
import jax
import jax.numpy as jnp
from jax.experimental import pallas as pl
from jax.experimental.pallas import tpu as pltpu


# ----------------------------------------------------------------------------
# Model dimensions (fixed by the module config used here)
# ----------------------------------------------------------------------------
D_IN = 32          # input_dim
K0 = 64            # k_list[0]
K1 = 32            # k_list[1]
LAT = K1 // 2      # 16 (latent dim)

# Packed-weight layout: rows = input dims of each layer, cols padded to 64.
# Row offsets are all multiples of 16 -> clean bf16 sublane tiling for sub-slices.
_W_ROWS = [D_IN, K0, K1, LAT, K1, K0]          # w0, w1, w_heads, wd0, wd1, wd2
_W_COLS = [K0, K1, 2 * LAT, K1, K0, D_IN]
_W_OFF = [0]
for _r in _W_ROWS:
    _W_OFF.append(_W_OFF[-1] + _r)             # [0, 32, 96, 128, 144, 176, 240]

W_PACK_ROWS = _W_OFF[-1]                       # 240
W_PACK_COLS = 64
# Packed biases: one bias per row, every bias starts at lane 0 (VPU broadcast-add).
B_PACK_ROWS = 8
B_PACK_COLS = 128

# Output slab layout (lane-dense, padded to 128 lanes)
OUT_ENC = (0, K1)                              # cols  0:32  -> x_enc_prev
OUT_MU = (K1, K1 + LAT)                        # cols 32:48  -> mu
OUT_LV = (K1 + LAT, K1 + 2 * LAT)              # cols 48:64  -> logvar
OUT_DEC = (K1 + 2 * LAT, K1 + 2 * LAT + D_IN)  # cols 64:96  -> x_dec
OUT_USED = OUT_DEC[1]                          # 96 written lanes; 96:128 unwritten
OUT_W = 128

MAX_BATCH_TILE = 8192                          # ~11 MiB double-buffered per step
VMEM_LIMIT_BYTES = 48 * 1024 * 1024            # < v7x 64 MiB physical; >> needed


# ----------------------------------------------------------------------------
# Pallas kernel: whole VAE forward fused into one grid step (tiles over batch).
# ----------------------------------------------------------------------------
def vae_fwd_kernel(x_ref, eps_ref, wpack_ref, bpack_ref, out_ref):
    f32 = jnp.float32
    bf16 = jnp.bfloat16

    # Static slices of the packed bf16 weights (row offsets are 16-aligned,
    # column slices all start at lane 0 -> cheap sub-tile views).
    w0 = wpack_ref[_W_OFF[0]:_W_OFF[1], 0:_W_COLS[0]]   # (32, 64)
    w1 = wpack_ref[_W_OFF[1]:_W_OFF[2], 0:_W_COLS[1]]   # (64, 32)
    wh = wpack_ref[_W_OFF[2]:_W_OFF[3], 0:_W_COLS[2]]   # (32, 32) fused mu|sigma
    wd0 = wpack_ref[_W_OFF[3]:_W_OFF[4], 0:_W_COLS[3]]  # (16, 32)
    wd1 = wpack_ref[_W_OFF[4]:_W_OFF[5], 0:_W_COLS[4]]  # (32, 64)
    wd2 = wpack_ref[_W_OFF[5]:_W_OFF[6], 0:_W_COLS[5]]  # (64, 32)

    # Lane-0-aligned f32 biases: plain broadcast adds, no cross-lane rotates.
    b0 = bpack_ref[0:1, 0:_W_COLS[0]]
    b1 = bpack_ref[1:2, 0:_W_COLS[1]]
    bh = bpack_ref[2:3, 0:_W_COLS[2]]
    bd0 = bpack_ref[3:4, 0:_W_COLS[3]]
    bd1 = bpack_ref[4:5, 0:_W_COLS[4]]
    bd2 = bpack_ref[5:6, 0:_W_COLS[5]]

    x = x_ref[...]
    eps = eps_ref[...]

    # --- encoder: Linear + ReLU, Linear + ReLU (bf16 MXU, f32 accumulation) ---
    h = jnp.maximum(jnp.dot(x.astype(bf16), w0, preferred_element_type=f32) + b0, 0.0)
    h = jnp.maximum(jnp.dot(h.astype(bf16), w1, preferred_element_type=f32) + b1, 0.0)

    # --- fused mu / logvar heads: one (tb,32)@(32,32) MXU push -----------------
    heads = jnp.dot(h.astype(bf16), wh, preferred_element_type=f32) + bh     # (tb, 32)
    mu = heads[:, 0:LAT]
    lv = heads[:, LAT:2 * LAT]

    # --- reparameterize: z = mu + eps * exp(0.5 * logvar) (exp -> EUP slot) ----
    z = mu + eps * jnp.exp(0.5 * lv)                                          # (tb, 16)

    # --- decoder: Linear+ReLU, Linear+ReLU, Linear+Sigmoid ---------------------
    d = jnp.maximum(jnp.dot(z.astype(bf16), wd0, preferred_element_type=f32) + bd0, 0.0)
    d = jnp.maximum(jnp.dot(d.astype(bf16), wd1, preferred_element_type=f32) + bd1, 0.0)
    d = jax.nn.sigmoid(jnp.dot(d.astype(bf16), wd2, preferred_element_type=f32) + bd2)

    # --- single lane-dense store of the 96 used lanes: enc | mu|lv | dec -------
    # Lanes 96:128 of the output block are never read by the wrapper.
    out_ref[:, 0:OUT_USED] = jnp.concatenate([h, heads, d], axis=-1)


# ----------------------------------------------------------------------------
# Host-side packing of the per-layer parameters
# ----------------------------------------------------------------------------
def pack_params(params):
    """params: list of (W, b) with W in (in, out) layout, b in (1, out) layout.
    Returns (wpack (240,64) bf16, bpack (8,128) f32)."""
    (w0, b0), (w1, b1), (wmu, bmu), (wsg, bsg), (wd0, bd0), (wd1, bd1), (wd2, bd2) = params
    wh = jnp.concatenate([wmu, wsg], axis=1)     # (32, 32) fused heads
    bh = jnp.concatenate([bmu, bsg], axis=1)     # (1, 32)

    def pad_w(w):
        return jnp.pad(w, ((0, 0), (0, W_PACK_COLS - w.shape[1])))

    wpack = jnp.concatenate(
        [pad_w(w) for w in (w0, w1, wh, wd0, wd1, wd2)], axis=0
    ).astype(jnp.bfloat16)                       # (240, 64) bf16

    def pad_b(b):
        return jnp.pad(b, ((0, 0), (0, B_PACK_COLS - b.shape[1])))

    bpack = jnp.concatenate(
        [pad_b(b) for b in (b0, b1, bh, bd0, bd1, bd2)]
        + [jnp.zeros((B_PACK_ROWS - 6, B_PACK_COLS), jnp.float32)],
        axis=0,
    ).astype(jnp.float32)                        # (8, 128) f32, lane-0 aligned rows
    return wpack, bpack


# ----------------------------------------------------------------------------
# Generation-aware batch tiling (pad B up to a multiple of the chosen tile)
# ----------------------------------------------------------------------------
def _cdiv(a, b):
    return -(-a // b)


def _round_up(n, m):
    return _cdiv(n, m) * m


def _tensorcores_per_device():
    """2 TensorCores share the grid on v7x (and megacore v4/v5p); 1 on v5e/v6e."""
    try:
        kind = jax.devices()[0].device_kind.lower()
    except Exception:  # pragma: no cover - defensive
        return 1
    if ("v7" in kind) or ("v4" in kind) or ("v5p" in kind):
        return 2
    return 1


def _pick_tiling(B, requested=None, max_tile=MAX_BATCH_TILE):
    """Return (tile_rows, num_tiles). Batch is padded to tile_rows * num_tiles.

    Single-TC parts (v5e/v6e): fewest, largest tiles (often a single tile).
    Dual-TC parts (v7x): even number of tiles >= 2 so the 'parallel' batch axis
    splits evenly across the two TensorCores."""
    if requested is not None:
        tb = _round_up(max(int(requested), 8), 8)
        return tb, _cdiv(_round_up(B, 8), tb)

    b8 = _round_up(B, 8)
    if _tensorcores_per_device() >= 2 and b8 >= 16:
        tb = min(max_tile, _round_up(_cdiv(b8, 2), 8))
        n = _cdiv(b8, tb)
        if n % 2:
            n += 1                       # even tile count -> no idle core
    else:
        tb = min(max_tile, b8)
        n = _cdiv(b8, tb)
    return tb, n


# ----------------------------------------------------------------------------
# Wrappers
# ----------------------------------------------------------------------------
def vaeabl_forward_slab(x, eps, wpack, bpack, *, batch_tile=None):
    """Returns the packed (B_padded, 128) output slab (enc | mu | lv | dec | unused)."""
    B = x.shape[0]
    tb, num_tiles = _pick_tiling(B, batch_tile)
    b_total = tb * num_tiles
    if b_total != B:
        x = jnp.pad(x, ((0, b_total - B), (0, 0)))
        eps = jnp.pad(eps, ((0, b_total - B), (0, 0)))

    return pl.pallas_call(
        vae_fwd_kernel,
        out_shape=jax.ShapeDtypeStruct((b_total, OUT_W), jnp.float32),
        grid_spec=pltpu.PrefetchScalarGridSpec(
            num_scalar_prefetch=0,
            grid=(num_tiles,),
            in_specs=[
                pl.BlockSpec((tb, D_IN), lambda i: (i, 0)),                   # x
                pl.BlockSpec((tb, LAT), lambda i: (i, 0)),                    # eps
                pl.BlockSpec((W_PACK_ROWS, W_PACK_COLS), lambda i: (0, 0)),   # weights
                pl.BlockSpec((B_PACK_ROWS, B_PACK_COLS), lambda i: (0, 0)),   # biases
            ],
            out_specs=pl.BlockSpec((tb, OUT_W), lambda i: (i, 0)),
        ),
        compiler_params=pltpu.CompilerParams(
            dimension_semantics=("parallel",),    # batch tiles independent -> megacore
            vmem_limit_bytes=VMEM_LIMIT_BYTES,    # allow large tiles on every gen
        ),
    )(x, eps, wpack, bpack)


def vaeabl_forward(x, eps, wpack, bpack, *, batch_tile=None):
    """x: (B, 32) f32, eps: (B, 16) f32.  Returns (x_enc_prev, mu, logvar, x_dec).

    Call under jax.jit so the slab slices fuse into consumers instead of
    materializing extra HBM->HBM copies (or use vaeabl_forward_slab directly)."""
    B = x.shape[0]
    slab = vaeabl_forward_slab(x, eps, wpack, bpack, batch_tile=batch_tile)
    x_enc_prev = slab[:B, OUT_ENC[0]:OUT_ENC[1]]
    mu = slab[:B, OUT_MU[0]:OUT_MU[1]]
    logvar = slab[:B, OUT_LV[0]:OUT_LV[1]]
    x_dec = slab[:B, OUT_DEC[0]:OUT_DEC[1]]
    return x_enc_prev, mu, logvar, x_dec


# ----------------------------------------------------------------------------
# Deterministic parameter construction (PyTorch-style uniform init, transposed)
# ----------------------------------------------------------------------------
def make_linear(key, d_in, d_out):
    kw, kb = jax.random.split(key)
    bound = 1.0 / jnp.sqrt(float(d_in))
    w = jax.random.uniform(kw, (d_in, d_out), jnp.float32, -bound, bound)  # (in, out)
    b = jax.random.uniform(kb, (1, d_out), jnp.float32, -bound, bound)     # (1, out)
    return w, b


def reference_forward(x, eps, params):
    """Pure-JAX reference with identical semantics (bf16 weights/activations,
    f32 accumulation) for validation."""
    bf16, f32 = jnp.bfloat16, jnp.float32
    (w0, b0), (w1, b1), (wmu, bmu), (wsg, bsg), (wd0, bd0), (wd1, bd1), (wd2, bd2) = params

    def mm(a, w):
        return jnp.dot(a.astype(bf16), w.astype(bf16), preferred_element_type=f32)

    h = jnp.maximum(mm(x, w0) + b0, 0.0)
    h = jnp.maximum(mm(h, w1) + b1, 0.0)
    mu = mm(h, wmu) + bmu
    lv = mm(h, wsg) + bsg
    z = mu + eps * jnp.exp(0.5 * lv)
    d = jnp.maximum(mm(z, wd0) + bd0, 0.0)
    d = jnp.maximum(mm(d, wd1) + bd1, 0.0)
    xd = jax.nn.sigmoid(mm(d, wd2) + bd2)
    return h, mu, lv, xd


if __name__ == "__main__":
    # Small shapes consistent with the module; B=16 exercises the padded /
    # multi-tile path on dual-TC parts and the single-tile path on v5e/v6e.
    B = 16

    key = jax.random.PRNGKey(0)
    keys = jax.random.split(key, 9)

    params = [
        make_linear(keys[0], D_IN, K0),   # enc-0
        make_linear(keys[1], K0, K1),     # enc-1
        make_linear(keys[2], K1, LAT),    # mu_layer
        make_linear(keys[3], K1, LAT),    # sigma_layer
        make_linear(keys[4], LAT, K1),    # dec-0
        make_linear(keys[5], K1, K0),     # dec-1
        make_linear(keys[6], K0, D_IN),   # dec-2 (sigmoid output)
    ]
    wpack, bpack = pack_params(params)

    x = jax.random.normal(keys[7], (B, D_IN), jnp.float32)
    # eps for reparameterization is drawn outside the kernel (deterministic).
    # TODO(synk): in-kernel pltpu.prng_* could reproduce torch.randn_like's internal draw.
    eps = jax.random.normal(keys[8], (B, LAT), jnp.float32)

    # jit the wrapper so the slab slices fuse with downstream consumers.
    fwd = jax.jit(lambda xx, ee: vaeabl_forward(xx, ee, wpack, bpack))
    outs = jax.block_until_ready(fwd(x, eps))

    refs = reference_forward(x, eps, params)
    names = ("x_enc_prev", "mu", "logvar", "x_dec")
    for name, o, r in zip(names, outs, refs):
        assert o.shape == r.shape and o.dtype == r.dtype, name
        err = float(jnp.max(jnp.abs(o - r)))
        assert err < 2e-3, f"{name} mismatch vs reference (max abs err {err})"

    print("KERNEL_OK")
</pallas_src>

<mosaic_0001>
module attributes {stable_mosaic.version = 11 : i64} {
  func.func @vae_fwd_kernel(%arg0: i32, %arg1: memref<16x32xf32, #tpu.memory_space<vmem>>, %arg2: memref<16x16xf32, #tpu.memory_space<vmem>>, %arg3: memref<240x64xbf16, #tpu.memory_space<vmem>>, %arg4: memref<8x128xf32, #tpu.memory_space<vmem>>, %arg5: memref<16x128xf32, #tpu.memory_space<vmem>>) attributes {dimension_semantics = [#tpu.dimension_semantics<parallel>], iteration_bounds = array<i64: 1>, scalar_prefetch = 0 : i64, scratch_operands = 0 : i64, tpu.core_type = #tpu.core_type<tc>, window_params = [{transform_indices = @transform_0, window_bounds = array<i64: 16, 32>}, {transform_indices = @transform_1, window_bounds = array<i64: 16, 16>}, {pipeline_mode = #tpu.pipeline_mode<synchronous>, transform_indices = @transform_2, window_bounds = array<i64: 240, 64>}, {pipeline_mode = #tpu.pipeline_mode<synchronous>, transform_indices = @transform_3, window_bounds = array<i64: 8, 128>}, {transform_indices = @transform_4, window_bounds = array<i64: 16, 128>}]} {
    %c0 = arith.constant 0 : index
    %c0_0 = arith.constant 0 : index
    %0 = vector.load %arg3[%c0, %c0_0] : memref<240x64xbf16, #tpu.memory_space<vmem>>, vector<32x64xbf16>
    %c32 = arith.constant 32 : index
    %c0_1 = arith.constant 0 : index
    %1 = vector.load %arg3[%c32, %c0_1] : memref<240x64xbf16, #tpu.memory_space<vmem>>, vector<64x32xbf16>
    %c96 = arith.constant 96 : index
    %c0_2 = arith.constant 0 : index
    %2 = vector.load %arg3[%c96, %c0_2] : memref<240x64xbf16, #tpu.memory_space<vmem>>, vector<32x32xbf16>
    %c128 = arith.constant 128 : index
    %c0_3 = arith.constant 0 : index
    %3 = vector.load %arg3[%c128, %c0_3] : memref<240x64xbf16, #tpu.memory_space<vmem>>, vector<16x32xbf16>
    %c144 = arith.constant 144 : index
    %c0_4 = arith.constant 0 : index
    %4 = vector.load %arg3[%c144, %c0_4] : memref<240x64xbf16, #tpu.memory_space<vmem>>, vector<32x64xbf16>
    %c176 = arith.constant 176 : index
    %c0_5 = arith.constant 0 : index
    %5 = vector.load %arg3[%c176, %c0_5] : memref<240x64xbf16, #tpu.memory_space<vmem>>, vector<64x32xbf16>
    %c0_6 = arith.constant 0 : index
    %c0_7 = arith.constant 0 : index
    %6 = vector.load %arg4[%c0_6, %c0_7] : memref<8x128xf32, #tpu.memory_space<vmem>>, vector<1x64xf32>
    %c1 = arith.constant 1 : index
    %c0_8 = arith.constant 0 : index
    %7 = vector.load %arg4[%c1, %c0_8] : memref<8x128xf32, #tpu.memory_space<vmem>>, vector<1x32xf32>
    %c2 = arith.constant 2 : index
    %c0_9 = arith.constant 0 : index
    %8 = vector.load %arg4[%c2, %c0_9] : memref<8x128xf32, #tpu.memory_space<vmem>>, vector<1x32xf32>
    %c3 = arith.constant 3 : index
    %c0_10 = arith.constant 0 : index
    %9 = vector.load %arg4[%c3, %c0_10] : memref<8x128xf32, #tpu.memory_space<vmem>>, vector<1x32xf32>
    %c4 = arith.constant 4 : index
    %c0_11 = arith.constant 0 : index
    %10 = vector.load %arg4[%c4, %c0_11] : memref<8x128xf32, #tpu.memory_space<vmem>>, vector<1x64xf32>
    %c5 = arith.constant 5 : index
    %c0_12 = arith.constant 0 : index
    %11 = vector.load %arg4[%c5, %c0_12] : memref<8x128xf32, #tpu.memory_space<vmem>>, vector<1x32xf32>
    %c0_13 = arith.constant 0 : index
    %c0_14 = arith.constant 0 : index
    %12 = vector.load %arg1[%c0_13, %c0_14] : memref<16x32xf32, #tpu.memory_space<vmem>>, vector<16x32xf32>
    %c0_15 = arith.constant 0 : index
    %c0_16 = arith.constant 0 : index
    %13 = vector.load %arg2[%c0_15, %c0_16] : memref<16x16xf32, #tpu.memory_space<vmem>>, vector<16x16xf32>
    %14 = arith.truncf %12 : vector<16x32xf32> to vector<16x32xbf16>
    %cst = arith.constant dense<0.000000e+00> : vector<16x64xf32>
    %15 = tpu.matmul %14, %0, %cst {dimension_numbers = #tpu.dot_dimension_numbers<[1], [0], [0], [1], [0, 0, 1, 1], [], []>} : vector<16x32xbf16>, vector<32x64xbf16>, vector<16x64xf32> -> vector<16x64xf32>
    %16 = vector.broadcast %6 : vector<1x64xf32> to vector<16x64xf32>
    %17 = arith.addf %15, %16 : vector<16x64xf32>
    %cst_17 = arith.constant 0.000000e+00 : f32
    %18 = vector.broadcast %cst_17 : f32 to vector<16x64xf32>
    %19 = arith.maximumf %17, %18 : vector<16x64xf32>
    %20 = arith.truncf %19 : vector<16x64xf32> to vector<16x64xbf16>
    %cst_18 = arith.constant dense<0.000000e+00> : vector<16x32xf32>
    %21 = tpu.matmul %20, %1, %cst_18 {dimension_numbers = #tpu.dot_dimension_numbers<[1], [0], [0], [1], [0, 0, 1, 1], [], []>} : vector<16x64xbf16>, vector<64x32xbf16>, vector<16x32xf32> -> vector<16x32xf32>
    %22 = vector.broadcast %7 : vector<1x32xf32> to vector<16x32xf32>
    %23 = arith.addf %21, %22 : vector<16x32xf32>
    %cst_19 = arith.constant 0.000000e+00 : f32
    %24 = vector.broadcast %cst_19 : f32 to vector<16x32xf32>
    %25 = arith.maximumf %23, %24 : vector<16x32xf32>
    %26 = arith.truncf %25 : vector<16x32xf32> to vector<16x32xbf16>
    %cst_20 = arith.constant dense<0.000000e+00> : vector<16x32xf32>
    %27 = tpu.matmul %26, %2, %cst_20 {dimension_numbers = #tpu.dot_dimension_numbers<[1], [0], [0], [1], [0, 0, 1, 1], [], []>} : vector<16x32xbf16>, vector<32x32xbf16>, vector<16x32xf32> -> vector<16x32xf32>
    %28 = vector.broadcast %8 : vector<1x32xf32> to vector<16x32xf32>
    %29 = arith.addf %27, %28 : vector<16x32xf32>
    %30 = vector.extract_strided_slice %29 {offsets = [0, 0], sizes = [16, 16], strides = [1, 1]} : vector<16x32xf32> to vector<16x16xf32>
    %31 = vector.extract_strided_slice %29 {offsets = [0, 16], sizes = [16, 16], strides = [1, 1]} : vector<16x32xf32> to vector<16x16xf32>
    %cst_21 = arith.constant 5.000000e-01 : f32
    %32 = vector.broadcast %cst_21 : f32 to vector<16x16xf32>
    %33 = arith.mulf %32, %31 : vector<16x16xf32>
    %34 = math.exp %33 : vector<16x16xf32>
    %35 = arith.mulf %13, %34 : vector<16x16xf32>
    %36 = arith.addf %30, %35 : vector<16x16xf32>
    %37 = arith.truncf %36 : vector<16x16xf32> to vector<16x16xbf16>
    %cst_22 = arith.constant dense<0.000000e+00> : vector<16x32xf32>
    %38 = tpu.matmul %37, %3, %cst_22 {dimension_numbers = #tpu.dot_dimension_numbers<[1], [0], [0], [1], [0, 0, 1, 1], [], []>} : vector<16x16xbf16>, vector<16x32xbf16>, vector<16x32xf32> -> vector<16x32xf32>
    %39 = vector.broadcast %9 : vector<1x32xf32> to vector<16x32xf32>
    %40 = arith.addf %38, %39 : vector<16x32xf32>
    %cst_23 = arith.constant 0.000000e+00 : f32
    %41 = vector.broadcast %cst_23 : f32 to vector<16x32xf32>
    %42 = arith.maximumf %40, %41 : vector<16x32xf32>
    %43 = arith.truncf %42 : vector<16x32xf32> to vector<16x32xbf16>
    %cst_24 = arith.constant dense<0.000000e+00> : vector<16x64xf32>
    %44 = tpu.matmul %43, %4, %cst_24 {dimension_numbers = #tpu.dot_dimension_numbers<[1], [0], [0], [1], [0, 0, 1, 1], [], []>} : vector<16x32xbf16>, vector<32x64xbf16>, vector<16x64xf32> -> vector<16x64xf32>
    %45 = vector.broadcast %10 : vector<1x64xf32> to vector<16x64xf32>
    %46 = arith.addf %44, %45 : vector<16x64xf32>
    %cst_25 = arith.constant 0.000000e+00 : f32
    %47 = vector.broadcast %cst_25 : f32 to vector<16x64xf32>
    %48 = arith.maximumf %46, %47 : vector<16x64xf32>
    %49 = arith.truncf %48 : vector<16x64xf32> to vector<16x64xbf16>
    %cst_26 = arith.constant dense<0.000000e+00> : vector<16x32xf32>
    %50 = tpu.matmul %49, %5, %cst_26 {dimension_numbers = #tpu.dot_dimension_numbers<[1], [0], [0], [1], [0, 0, 1, 1], [], []>} : vector<16x64xbf16>, vector<64x32xbf16>, vector<16x32xf32> -> vector<16x32xf32>
    %51 = vector.broadcast %11 : vector<1x32xf32> to vector<16x32xf32>
    %52 = arith.addf %50, %51 : vector<16x32xf32>
    %53 = arith.negf %52 : vector<16x32xf32>
    %54 = math.exp %53 : vector<16x32xf32>
    %cst_27 = arith.constant 1.000000e+00 : f32
    %55 = vector.broadcast %cst_27 : f32 to vector<16x32xf32>
    %56 = arith.addf %55, %54 : vector<16x32xf32>
    %57 = arith.divf %55, %56 : vector<16x32xf32>
    %58 = tpu.concatenate %25, %29, %57 in 1 : vector<16x32xf32>, vector<16x32xf32>, vector<16x32xf32> -> vector<16x96xf32>
    %c0_28 = arith.constant 0 : index
    %c0_29 = arith.constant 0 : index
    %59 = vector.load %arg5[%c0_28, %c0_29] : memref<16x128xf32, #tpu.memory_space<vmem>>, vector<16x96xf32>
    tpu.vector_store %arg5[%c0_28, %c0_29], %58 {strides = array<i32>} : memref<16x128xf32, #tpu.memory_space<vmem>>, vector<16x96xf32>,
    return
  }
  func.func @transform_0(%arg0: i32) -> (i32, i32) {
    %c0_i32 = arith.constant 0 : i32
    %c0_i32_0 = arith.constant 0 : i32
    return %arg0, %c0_i32 : i32, i32
  }
  func.func @transform_1(%arg0: i32) -> (i32, i32) {
    %c0_i32 = arith.constant 0 : i32
    %c0_i32_0 = arith.constant 0 : i32
    return %arg0, %c0_i32 : i32, i32
  }
  func.func @transform_2(%arg0: i32) -> (i32, i32) {
    %c0_i32 = arith.constant 0 : i32
    %c0_i32_0 = arith.constant 0 : i32
    %c0_i32_1 = arith.constant 0 : i32
    return %c0_i32, %c0_i32_0 : i32, i32
  }
  func.func @transform_3(%arg0: i32) -> (i32, i32) {
    %c0_i32 = arith.constant 0 : i32
    %c0_i32_0 = arith.constant 0 : i32
    %c0_i32_1 = arith.constant 0 : i32
    return %c0_i32, %c0_i32_0 : i32, i32
  }
  func.func @transform_4(%arg0: i32) -> (i32, i32) {
    %c0_i32 = arith.constant 0 : i32
    %c0_i32_0 = arith.constant 0 : i32
    return %arg0, %c0_i32 : i32, i32
  }
}

</mosaic_0001>

<bundles_post_ra>
// kernel: _lambda_.1
= control target key start
LH: loop header
LB: loop body
LE: loop exit
PB: predicated region body
PF: predicated region fallthrough
CT: control target
= control target key end

     0   :  { %9 = vsyncpa [#allocation3], 0  ;;  %s922_s0 = inlined_call_operand.hbm [shape: f32[16,32], index: 0, kind: input, shape index: {}]   ;;  %s923_s1 = inlined_call_operand.hbm [shape: f32[16,16], index: 1, kind: input, shape index: {}]   ;;  %s924_s2 = inlined_call_operand.hbm [shape: bf16[240,64], index: 2, kind: input, shape index: {}]   ;;  %s925_s3 = inlined_call_operand.vmem [shape: f32[8,128], index: 3, kind: input, shape index: {}]   ;;  %s926_s4 = inlined_call_operand.vmem [shape: f32[16,128], index: 4, kind: output, shape index: {}]  }
   0x1   :  { %10 = vsyncpa [#allocation5], 0  ;;  %s765_s15 = smov [#allocation4]   ;;  %s766_s17 = smov [#allocation2]  }
   0x2   :  { %s28_s16 = sshll.u32 %s765_s15, 4  ;;  %s16_s18 = sshll.u32 %s766_s17, 4  ;;  %s29_s16 = int_to_ptr.vmem [resolvable:$true] %s28_s16  ;;  %s801_s18 = int_to_ptr.vmem [resolvable:$true] %s16_s18 }
   0x3   :  { %s695_s21 = scalar_lea.hbm %s923_s1, 256 }
   0x4   :  { %p696_p0 = scmp.ne.s32.totalorder %s923_s1, %s695_s21  ;;  %p699_p1 = scmp.lt.u32.totalorder %s695_s21, %s923_s1 }
   0x6   :  { %p701_p2 = pnand %p699_p1, %p696_p0 }
   0x8   :  { %704 = shalt.err (!%p701_p2)
}
   0x9   :  { %s705_s26 = scalar_lea.vmem %s29_s16, 256  ;;  %p710_p4 = scmp.lt.s32.totalorder %s29_s16, %s29_s16 }
   0xa   :  { %p706_p3 = scmp.ne.s32.totalorder %s29_s16, %s705_s26  ;;  %p711_p5 = scmp.lt.s32.totalorder %s705_s26, %s705_s26 }
   0xc   :  { %p712_p6 = por %p711_p5, %p710_p4 }
   0xe   :  { %p713_p7 = pnand %p712_p6, %p706_p3 }
  0x10   :  { %716 = shalt.err (!%p713_p7)
}
  0x11   :  { %s767_s27 = smov 128   ;;  %s768_s28 = smov 8  }
  0x12   :  { %34 = dma.hbm_to_vmem [thread:$0]  %s923_s1, 256, %s29_s16, [#allocation5], %s767_s27, %s767_s27, %s768_s28  }
  0x13   :  { %s717_s7 = scalar_lea.hbm %s922_s0, 256 }
  0x14   :  { %p718_p8 = scmp.ne.s32.totalorder %s922_s0, %s717_s7  ;;  %p721_p9 = scmp.lt.u32.totalorder %s717_s7, %s922_s0 }
  0x16   :  { %p723_p10 = pnand %p721_p9, %p718_p8 }
  0x18   :  { %726 = shalt.err (!%p723_p10)
}
  0x19   :  { %s727_s12 = scalar_lea.vmem %s801_s18, 256  ;;  %p732_p12 = scmp.lt.s32.totalorder %s801_s18, %s801_s18 }
  0x1a   :  { %p728_p11 = scmp.ne.s32.totalorder %s801_s18, %s727_s12  ;;  %p733_p13 = scmp.lt.s32.totalorder %s727_s12, %s727_s12 }
  0x1c   :  { %p734_p0 = por %p733_p13, %p732_p12 }
  0x1e   :  { %p735_p1 = pnand %p734_p0, %p728_p11 }
  0x20   :  { %738 = shalt.err (!%p735_p1)
}
  0x21   :  { %22 = dma.hbm_to_vmem [thread:$0]  %s922_s0, 256, %s801_s18, [#allocation3], %s767_s27, %s767_s27, %s768_s28  }
  0x22   :  { %s769_s14 = smov [#allocation6]   ;;  %s739_s19 = scalar_lea.hbm %s924_s2, 1920 }
  0x23   :  { %s40_s15 = sshll.u32 %s769_s14, 4  ;;  %p740_p2 = scmp.ne.s32.totalorder %s924_s2, %s739_s19  ;;  %s41_s15 = int_to_ptr.vmem [resolvable:$true] %s40_s15 }
  0x24   :  { %p743_p3 = scmp.lt.u32.totalorder %s739_s19, %s924_s2 }
  0x26   :  { %p745_p4 = pnand %p743_p3, %p740_p2 }
  0x28   :  { %748 = shalt.err (!%p745_p4)
}
  0x29   :  { %s749_s24 = scalar_lea.vmem %s41_s15, 1920  ;;  %p754_p6 = scmp.lt.s32.totalorder %s41_s15, %s41_s15 }
  0x2a   :  { %p750_p5 = scmp.ne.s32.totalorder %s41_s15, %s749_s24  ;;  %p755_p7 = scmp.lt.s32.totalorder %s749_s24, %s749_s24 }
  0x2c   :  { %p756_p8 = por %p755_p7, %p754_p6 }
  0x2e   :  { %p757_p9 = pnand %p756_p8, %p750_p5 }
  0x30   :  { %760 = shalt.err (!%p757_p9)
}
  0x31   :  { %s770_s0 = smov 64   ;;  %s771_s18 = smov 4  }
  0x32   :  { %46 = dma.hbm_to_vmem [thread:$0]  %s924_s2, 1920, %s41_s15, [#allocation5], %s770_s0, %s770_s0, %s771_s18  }
  0x33   :  { %761 = dma.done.wait [#allocation3], 256  }
  0x34   :  { %762 = vsyncadd [#allocation3], 4294967040 }
  0x35   :  { %763 = dma.done.wait [#allocation5], 2176  }
  0x36   :  { %764 = vsyncadd [#allocation5], 4294965120  ;;  %v772_v0 = vmov 0.0   ;;  %vm773_vm0 = vmmov 0   ;;  %v668_v1 = vld [vmem:[#allocation6] sm:$0xff]   ;;  %v669_v2 = vld [vmem:[#allocation6 + $0x8] sm:$0xff]  }
  0x37   :  { %603 = vmatprep.subr.bf16.mxu1 %v772_v0  ;;  %607 = vmatprep.mubr.msk.bf16.mxu1 %vm773_vm0, %v772_v0  ;;  %v95_v3 = vld [vmem:[#allocation2] sm:$0xff]  ;;  %v96_v4 = vld [vmem:[#allocation2 + $0x8] sm:$0xff]  ;;  %vm116_vm1 = vcmask 261120   ;;  %v670_v5 = vld [vmem:[#allocation6 + $0x10] sm:$0xff]   ;;  %vm192_vm2 = vcmask 523264   ;;  %s774_s6 = smov 32  }
  0x38   :  { %623 = vmatprep.subr.bf16.mxu0 %v772_v0  ;;  %627 = vmatprep.mubr.msk.bf16.mxu0 %vm773_vm0, %v772_v0  ;;  %v99_v6 = vpack.c.bf16 %v96_v4, %v95_v3  ;;  %v671_v7 = vld [vmem:[#allocation6 + $0x18] sm:$0xff]   ;;  %v672_v8 = vld [vmem:[#allocation6 + $0x20] sm:$0xff]   ;;  %v673_v9 = vld [vmem:[#allocation6 + $0x28] sm:$0xff]   ;;  %s775_s7 = smov 112   ;;  %vm329_vm3 = vcmask 130048   ;;  %vm544_vm4 = vcmask 785408  }
  0x39   :  { %604 = vmatpush3.bf16.msra.mxu1 %v668_v1  ;;  %v553_v10 = vld [vmem:[%s925_s3] ss:$0 sm:$0xff]  ;;  %v674_v20 = vld [vmem:[#allocation6 + $0x30] sm:$0xff]   ;;  %v675_v21 = vld [vmem:[#allocation6 + $0x38] sm:$0xff]  }
  0x3a   :  { %605 = vmatprep.subr.bf16.mxu1 %v772_v0  ;;  %624 = vmatpush3.bf16.msra.mxu0 %v674_v20  ;;  %v557_v22 = vld [vmem:[%s925_s3 + $0x1] ss:$0 sm:$0xff]  ;;  %v563_v32 = vld [vmem:[%s925_s3 + $0x2] ss:$0 sm:$0xff]  ;;  %v97_v46 = vld [vmem:[#allocation4] sm:$0xff] }
  0x3b   :  { %625 = vmatprep.subr.bf16.mxu0 %v772_v0  ;;  %v676_v43 = vld [vmem:[#allocation6 + $0x40] sm:$0xff]   ;;  %v98_v48 = vld [vmem:[#allocation4 + $0x8] sm:$0xff]  ;;  %v677_v55 = vld [vmem:[#allocation6 + $0x48] sm:$0xff]  }
  0x3c   :  { %v678_v56 = vld [vmem:[#allocation6 + $0x50] sm:$0xff]   ;;  %v679_v57 = vld [vmem:[#allocation6 + $0x58] sm:$0xff]   ;;  %v680_v58 = vld [vmem:[#allocation6 + $0x60] sm:$0xff]  }
  0x3d   :  { %606 = vmatpush3.bf16.msra.mxu1 %v669_v2  ;;  %v567_v59 = vld [vmem:[%s925_s3 + $0x3] ss:$0 sm:$0xff] }
  0x3e   :  { %611 = vmatprep.subr.bf16.mxu1 %v772_v0  ;;  %626 = vmatpush3.bf16.msra.mxu0 %v675_v21 }
  0x3f   :  { %631 = vmatprep.subr.bf16.mxu0 %v772_v0 }
  0x40   :  { %608 = vmatmul.mubr.msk.bf16.vlgmr.msra.gmra.mrb[0].mxu1 %vm116_vm1, %v99_v6  ;;  %v681_v6 = vld [vmem:[#allocation6 + $0x68] sm:$0xff]  }
  0x41   :  { %612 = vmatpush3.bf16.msra.mxu1 %v670_v5  ;;  %619 = vmatprep.mubr.msk.bf16.mxu1 %vm773_vm0, %v772_v0 }
  0x42   :  { %613 = vmatprep.subr.bf16.mxu1 %v772_v0 }
  0x45   :  { %614 = vmatpush3.bf16.msra.mxu1 %v671_v7  ;;  %v682_v7 = vld [vmem:[#allocation6 + $0x70] sm:$0xff]  }
  0x46   :  { %615 = vmatprep.subr.bf16.mxu1 %v772_v0 }
  0x49   :  { %616 = vmatpush3.bf16.msra.mxu1 %v672_v8  ;;  %v570_v8 = vld [vmem:[%s925_s3 + $0x4] ss:$0 sm:$0xff] }
  0x4a   :  { %617 = vmatprep.subr.bf16.mxu1 %v772_v0 }
  0x4d   :  { %618 = vmatpush3.bf16.msra.mxu1 %v673_v9 }
  0x4e   :  { %637 = vmatprep.subr.bf16.mxu1 %v772_v0 }
 0x113   :  { %v154_v11 = vpop.f32.mrb[0].mxu1 }
 0x114   :  { %v155_v12 = vadd.f32 %v553_v10, %v154_v11  ;;  %v609_v13 = vpop.f32.mrb[1].mxu1 }
 0x115   :  { %v157_v14 = vpop.f32.mrb[2].mxu1 }
 0x116   :  { %v158_v15 = vadd.f32 %v553_v10, %v157_v14  ;;  %v610_v16 = vpop.f32.mrb[3].mxu1  ;;  %v161_v17 = vmax.f32 %v155_v12, 0.0 }
 0x118   :  { %v162_v18 = vmax.f32 %v158_v15, 0.0 }
 0x11a   :  { %v163_v19 = vpack.c.bf16 %v162_v18, %v161_v17 }
 0x11c   :  { %620 = vmatmul.mubr.msk.bf16.vlgmr.msra.gmra.mrb[4].mxu1 %vm192_vm2, %v163_v19 }
 0x11d   :  { %641 = vmatprep.mubr.msk.bf16.mxu1 %vm773_vm0, %v772_v0  ;;  %638 = vmatpush3.bf16.msra.mxu1 %v677_v55 }
 0x11e   :  { %639 = vmatprep.subr.bf16.mxu1 %v772_v0 }
 0x121   :  { %640 = vmatpush3.bf16.msra.mxu1 %v678_v56 }
 0x1ef   :  { %v230_v23 = vpop.f32.mrb[4].mxu1 }
 0x1f0   :  { %v872_v24 = vadd.f32 %v557_v22, %v230_v23  ;;  %v621_v25 = vpop.f32.mrb[5].mxu1 }
 0x1f1   :  { %v233_v26 = vpop.f32.mrb[6].mxu1 }
 0x1f2   :  { %v874_v27 = vadd.f32 %v557_v22, %v233_v26  ;;  %v622_v28 = vpop.f32.mrb[7].mxu1  ;;  %v237_v29 = vmax.f32 %v872_v24, 0.0 }
 0x1f4   :  { %v238_v30 = vmax.f32 %v874_v27, 0.0 }
 0x1f6   :  { %v239_v31 = vpack.c.bf16 %v238_v30, %v237_v29 }
 0x1f8   :  { %628 = vmatmul.mubr.msk.bf16.vlgmr.msra.gmra.mrb[0].mxu0 %vm116_vm1, %v239_v31 }
 0x1f9   :  { %633 = vmatprep.mubr.msk.bf16.mxu0 %vm773_vm0, %v772_v0  ;;  %632 = vmatpush3.bf16.msra.mxu0 %v676_v43 }
 0x1fa   :  { %645 = vmatprep.subr.bf16.mxu0 %v772_v0 }
 0x2cb   :  { %v293_v33 = vpop.f32.mrb[0].mxu0 }
 0x2cc   :  { %v294_v34 = vadd.f32 %v563_v32, %v293_v33  ;;  %v629_v35 = vpop.f32.mrb[1].mxu0 }
 0x2cd   :  { %v296_v36 = vpop.f32.mrb[2].mxu0 }
 0x2ce   :  { %v300_v37 = vmul.f32 0.5, %v294_v34  ;;  %v297_v38 = vadd.f32 %v563_v32, %v296_v36  ;;  %526 = vrot.lane.b32.xlu1 %v294_v34, %s774_s6  ;;  %v630_v39 = vpop.f32.mrb[3].mxu0 }
 0x2d0   :  { %v302_v40 = vmul.f32 1.442695, %v300_v37  ;;  %v301_v41 = vmul.f32 0.5, %v297_v38 }
 0x2d2   :  { %683 = vpow2.f32 %v302_v40  ;;  %v304_v42 = vmul.f32 1.442695, %v301_v41  ;;  %528 = vrot.lane.b32.xlu1 %v297_v38, %s774_s6 }
 0x2d4   :  { %685 = vpow2.f32 %v304_v42 }
 0x2dc   :  { %v684_v44 = vpop.eup %683 }
 0x2dd   :  { %308 = vrot.lane.b32.xlu0 %v684_v44, %s775_s7 }
 0x2de   :  { %v686_v45 = vpop.eup %685 }
 0x2e1   :  { %310 = vrot.lane.b32.xlu0 %v686_v45, %s775_s7 }
 0x340   :  { %v527_v36 = vpop.permute.xlu1 %526 }
 0x344   :  { %v529_v37 = vpop.permute.xlu1 %528 }
 0x345   :  { %v541_v41 = vsel %vm116_vm1, %v238_v30, %v529_v37 }
 0x34f   :  { %v309_v47 = vpop.permute.xlu0 %308 }
 0x350   :  { %v314_v49 = vmul.f32 %v309_v47, %v97_v46 }
 0x352   :  { %v316_v52 = vadd.f32 %v314_v49, %v294_v34 }
 0x353   :  { %v311_v50 = vpop.permute.xlu0 %310 }
 0x354   :  { %v315_v51 = vmul.f32 %v311_v50, %v98_v48 }
 0x356   :  { %v317_v53 = vadd.f32 %v315_v51, %v297_v38  ;;  %v540_v38 = vsel %vm116_vm1, %v237_v29, %v527_v36 }
 0x358   :  { %v318_v54 = vpack.c.bf16 %v317_v53, %v316_v52 }
 0x35a   :  { %634 = vmatmul.mubr.msk.bf16.vlgmr.msra.gmra.mrb[4].mxu0 %vm329_vm3, %v318_v54 }
 0x35b   :  { %653 = vmatprep.mubr.msk.bf16.mxu0 %vm773_vm0, %v772_v0  ;;  %646 = vmatpush3.bf16.msra.mxu0 %v679_v57 }
 0x35c   :  { %647 = vmatprep.subr.bf16.mxu0 %v772_v0 }
 0x35f   :  { %648 = vmatpush3.bf16.msra.mxu0 %v680_v58 }
 0x360   :  { %649 = vmatprep.subr.bf16.mxu0 %v772_v0 }
 0x363   :  { %650 = vmatpush3.bf16.msra.mxu0 %v681_v6 }
 0x364   :  { %651 = vmatprep.subr.bf16.mxu0 %v772_v0  ;;  %v574_v0 = vld [vmem:[%s925_s3 + $0x5] ss:$0 sm:$0xff] }
 0x367   :  { %652 = vmatpush3.bf16.msra.mxu0 %v682_v7 }
 0x42d   :  { %v367_v60 = vpop.f32.mrb[4].mxu0 }
 0x42e   :  { %v368_v61 = vadd.f32 %v567_v59, %v367_v60  ;;  %v635_v62 = vpop.f32.mrb[5].mxu0 }
 0x42f   :  { %v370_v63 = vpop.f32.mrb[6].mxu0 }
 0x430   :  { %v371_v1 = vadd.f32 %v567_v59, %v370_v63  ;;  %v636_v2 = vpop.f32.mrb[7].mxu0  ;;  %v374_v3 = vmax.f32 %v368_v61, 0.0 }
 0x432   :  { %v375_v4 = vmax.f32 %v371_v1, 0.0 }
 0x434   :  { %v376_v5 = vpack.c.bf16 %v375_v4, %v374_v3 }
 0x436   :  { %642 = vmatmul.mubr.msk.bf16.vlgmr.msra.gmra.mrb[8].mxu1 %vm116_vm1, %v376_v5 }
 0x509   :  { %v430_v9 = vpop.f32.mrb[8].mxu1 }
 0x50a   :  { %v431_v10 = vadd.f32 %v570_v8, %v430_v9  ;;  %v643_v11 = vpop.f32.mrb[9].mxu1 }
 0x50b   :  { %v433_v12 = vpop.f32.mrb[10].mxu1 }
 0x50c   :  { %v434_v13 = vadd.f32 %v570_v8, %v433_v12  ;;  %v644_v14 = vpop.f32.mrb[11].mxu1  ;;  %v437_v15 = vmax.f32 %v431_v10, 0.0 }
 0x50e   :  { %v438_v16 = vmax.f32 %v434_v13, 0.0 }
 0x510   :  { %v439_v17 = vpack.c.bf16 %v438_v16, %v437_v15 }
 0x512   :  { %654 = vmatmul.mubr.msk.bf16.vlgmr.msra.gmra.mrb[8].mxu0 %vm192_vm2, %v439_v17 }
 0x5e5   :  { %v505_v18 = vpop.f32.mrb[8].mxu0 }
 0x5e6   :  { %v506_v19 = vadd.f32 %v574_v0, %v505_v18  ;;  %v655_v20 = vpop.f32.mrb[9].mxu0 }
 0x5e7   :  { %v508_v21 = vpop.f32.mrb[10].mxu0 }
 0x5e8   :  { %v580_v22 = vmul.f32 -1.442695, %v506_v19  ;;  %v509_v23 = vadd.f32 %v574_v0, %v508_v21  ;;  %v656_v25 = vpop.f32.mrb[11].mxu0 }
 0x5ea   :  { %687 = vpow2.f32 %v580_v22  ;;  %v581_v26 = vmul.f32 -1.442695, %v509_v23 }
 0x5ec   :  { %689 = vpow2.f32 %v581_v26 }
 0x5f4   :  { %v688_v28 = vpop.eup %687 }
 0x5f5   :  { %v518_v31 = vadd.f32 1.0, %v688_v28 }
 0x5f6   :  { %v690_v32 = vpop.eup %689 }
 0x5f7   :  { %691 = vrcp.f32 %v518_v31  ;;  %v519_v33 = vadd.f32 1.0, %v690_v32 }
 0x5f9   :  { %693 = vrcp.f32 %v519_v33 }
 0x601   :  { %v692_v34 = vpop.eup %691 }
 0x602   :  { %534 = vrot.lane.b32.xlu0 %v692_v34, %s770_s0 }
 0x603   :  { %v694_v35 = vpop.eup %693 }
 0x604   :  { %536 = vrot.lane.b32.xlu1 %v694_v35, %s770_s0 }
 0x674   :  { %v535_v39 = vpop.permute.xlu0 %534 }
 0x675   :  { %v542_v40 = vsel %vm192_vm2, %v540_v38, %v535_v39 }
 0x676   :  { %545 = vst.msk [vmem:[%s926_s4] sm:$0xff] %vm544_vm4, %v542_v40  ;;  %v537_v42 = vpop.permute.xlu1 %536 }
 0x677   :  { %v543_v43 = vsel %vm192_vm2, %v541_v41, %v537_v42 }
 0x678   :  { %546 = vst.msk [vmem:[%s926_s4 + $0x8] sm:$0xff] %vm544_vm4, %v543_v43 }
 0x679   :  { %551 = vsyncpa [#allocation3], 1 }
 0x67a   :  { %552 = vsyncpa [#allocation5], 1 }

</bundles_post_ra>
